<compile_context>
chip_gen: v5e
topology: v5e:2x2
jax: 0.10.0
libtpu: 0.0.40
codegen_flags: <defaults>
</compile_context>

<pallas_src>
import jax
import jax.numpy as jnp
from jax.experimental import pallas as pl
from jax.experimental.pallas import tpu as pltpu

IN_FEATURES = 28 * 28   # 784
HIDDEN = 5
OUT_FEATURES = 10
OUT_PAD = 128           # lane-dense padded output width
MAX_TB = 1024           # max batch-tile rows (review: 512 -> 1024)


def _round_up(a, m):
    return ((a + m - 1) // m) * m


def _choose_batch_tile(rows, max_tb, group):
    """Largest tile <= max_tb (multiple of `group`) whose padding waste is at
    most max(group, rows // 64)  (~1.6% extra HBM traffic worst case)."""
    cap = max(group, (min(max_tb, rows) // group) * group)
    budget = max(group, rows // 64)
    for tb in range(cap, group - 1, -group):
        if _round_up(rows, tb) - rows <= budget:
            return tb
    return group  # tb == group is always exact (rows is a multiple of group)


def _fused_mlp_kernel(x_ref, w_ref, b_ref, o_ref):
    # x_ref: (tb, 784) bf16 | w_ref: (784, 128) bf16 (resident)
    # b_ref: (1, 128) f32   | o_ref: (tb, 128) f32
    y = jnp.dot(x_ref[...], w_ref[...], preferred_element_type=jnp.float32)
    o_ref[...] = (y + b_ref[...]).astype(o_ref.dtype)


def fuse_and_pad_params(w1, b1, w2, b2, compute_dtype=jnp.bfloat16):
    """Exact algebraic fusion of the two linears, done ONCE per weight set
    (hoisted out of the per-call path):
        (x @ w1 + b1) @ w2 + b2 == x @ (w1 @ w2) + (b1 @ w2 + b2)."""
    w_eff = (w1 @ w2).astype(jnp.float32)        # (784, 10), fused in f32
    b_eff = (b1 @ w2 + b2).astype(jnp.float32)   # (1, 10)
    w_pad = jnp.zeros((IN_FEATURES, OUT_PAD), compute_dtype)
    w_pad = w_pad.at[:, :OUT_FEATURES].set(w_eff.astype(compute_dtype))
    b_pad = jnp.zeros((1, OUT_PAD), jnp.float32)
    b_pad = b_pad.at[:, :OUT_FEATURES].set(b_eff)
    return w_pad, b_pad


def aiimage_forward(x_img, w_pad, b_pad, *, use_core_parallel=True,
                    return_padded=False):
    """x_img: (N, 1, 28, 28) f32 -> logits (N, 10) f32.
    w_pad/b_pad come from fuse_and_pad_params (precomputed once)."""
    n = x_img.shape[0]
    # Flatten + cast to the (bf16) streaming dtype: halves the dominant HBM read.
    x = x_img.reshape(n, -1).astype(w_pad.dtype)
    assert x.shape[1] == IN_FEATURES

    # Batch tiling: pad only to the sublane-packing group, then pick a tile
    # that keeps padding waste small (no round-up-to-tile blowup).
    group = 16 if w_pad.dtype == jnp.bfloat16 else 8
    rows = _round_up(max(n, 1), group)
    tb = _choose_batch_tile(rows, MAX_TB, group)
    n_pad = _round_up(rows, tb)
    if n_pad != n:
        x = jnp.pad(x, ((0, n_pad - n), (0, 0)))
    grid = (n_pad // tb,)

    # Real 2-TC sharding on v7x when there is work to split; harmless (1 TC)
    # on v5e/v6e.  Single-tile case stays on the plain PARALLEL path.
    dim_sem = (pltpu.CORE_PARALLEL if (use_core_parallel and grid[0] > 1)
               else pltpu.PARALLEL,)

    out = pl.pallas_call(
        _fused_mlp_kernel,
        out_shape=jax.ShapeDtypeStruct((n_pad, OUT_PAD), jnp.float32),
        grid_spec=pltpu.PrefetchScalarGridSpec(
            num_scalar_prefetch=0,
            grid=grid,
            in_specs=[
                # activation tile marches over the batch (double-buffered DMA)
                pl.BlockSpec((tb, IN_FEATURES), lambda i: (i, 0)),
                # fused weight / bias stay resident (constant index_map)
                pl.BlockSpec((IN_FEATURES, OUT_PAD), lambda i: (0, 0)),
                pl.BlockSpec((1, OUT_PAD), lambda i: (0, 0)),
            ],
            out_specs=pl.BlockSpec((tb, OUT_PAD), lambda i: (i, 0)),
        ),
        compiler_params=pltpu.CompilerParams(dimension_semantics=dim_sem),
    )(x, w_pad, b_pad)

    if return_padded:
        # Let the consumer read the lane-dense (n_pad, 128) slab directly and
        # avoid the extra slice kernel on an HBM-bound pipeline.
        return out
    return out[:n, :OUT_FEATURES]


def init_params(key):
    """Deterministic init mimicking torch.nn.Linear defaults
    (uniform(-1/sqrt(fan_in), 1/sqrt(fan_in)))."""
    k1, k2, k3, k4 = jax.random.split(key, 4)
    bound1 = 1.0 / (IN_FEATURES ** 0.5)
    bound2 = 1.0 / (HIDDEN ** 0.5)
    w1 = jax.random.uniform(k1, (IN_FEATURES, HIDDEN), jnp.float32,
                            minval=-bound1, maxval=bound1)
    b1 = jax.random.uniform(k2, (1, HIDDEN), jnp.float32,
                            minval=-bound1, maxval=bound1)
    w2 = jax.random.uniform(k3, (HIDDEN, OUT_FEATURES), jnp.float32,
                            minval=-bound2, maxval=bound2)
    b2 = jax.random.uniform(k4, (1, OUT_FEATURES), jnp.float32,
                            minval=-bound2, maxval=bound2)
    return w1, b1, w2, b2


if __name__ == "__main__":
    key = jax.random.PRNGKey(0)
    kx, kp = jax.random.split(key)

    # Small MNIST-like batch: (batch=2, channels=1, 28, 28)
    x_img = jax.random.normal(kx, (2, 1, 28, 28), jnp.float32)
    w1, b1, w2, b2 = init_params(kp)

    # One-time weight fusion + lane padding (hoisted out of the hot path).
    w_pad, b_pad = fuse_and_pad_params(w1, b1, w2, b2)

    fwd = jax.jit(aiimage_forward,
                  static_argnames=("use_core_parallel", "return_padded"))
    out = jax.block_until_ready(fwd(x_img, w_pad, b_pad))

    # Sanity-check against a pure-JAX f32 reference of the unfused math.
    # (bf16 activation stream -> tolerance loosened accordingly.)
    ref = (x_img.reshape(2, -1) @ w1 + b1) @ w2 + b2
    assert out.shape == (2, OUT_FEATURES)
    assert jnp.allclose(out, ref, atol=2e-2, rtol=2e-2), (
        f"max abs err {float(jnp.max(jnp.abs(out - ref)))}")

    print("KERNEL_OK")
</pallas_src>

<mosaic_0001>
module attributes {stable_mosaic.version = 11 : i64} {
  func.func @_fused_mlp_kernel(%arg0: i32, %arg1: memref<16x784xbf16, #tpu.memory_space<vmem>>, %arg2: memref<784x128xbf16, #tpu.memory_space<vmem>>, %arg3: memref<1x128xf32, #tpu.memory_space<vmem>>, %arg4: memref<16x128xf32, #tpu.memory_space<vmem>>) attributes {dimension_semantics = [#tpu.dimension_semantics<parallel>], iteration_bounds = array<i64: 1>, scalar_prefetch = 0 : i64, scratch_operands = 0 : i64, tpu.core_type = #tpu.core_type<tc>, window_params = [{transform_indices = @transform_0, window_bounds = array<i64: 16, 784>}, {pipeline_mode = #tpu.pipeline_mode<synchronous>, transform_indices = @transform_1, window_bounds = array<i64: 784, 128>}, {pipeline_mode = #tpu.pipeline_mode<synchronous>, transform_indices = @transform_2, window_bounds = array<i64: 1, 128>}, {transform_indices = @transform_3, window_bounds = array<i64: 16, 128>}]} {
    %c0 = arith.constant 0 : index
    %c0_0 = arith.constant 0 : index
    %0 = vector.load %arg1[%c0, %c0_0] : memref<16x784xbf16, #tpu.memory_space<vmem>>, vector<16x784xbf16>
    %c0_1 = arith.constant 0 : index
    %c0_2 = arith.constant 0 : index
    %1 = vector.load %arg2[%c0_1, %c0_2] : memref<784x128xbf16, #tpu.memory_space<vmem>>, vector<784x128xbf16>
    %cst = arith.constant dense<0.000000e+00> : vector<16x128xf32>
    %2 = tpu.matmul %0, %1, %cst {dimension_numbers = #tpu.dot_dimension_numbers<[1], [0], [0], [1], [0, 0, 1, 1], [], []>} : vector<16x784xbf16>, vector<784x128xbf16>, vector<16x128xf32> -> vector<16x128xf32>
    %c0_3 = arith.constant 0 : index
    %c0_4 = arith.constant 0 : index
    %3 = vector.load %arg3[%c0_3, %c0_4] : memref<1x128xf32, #tpu.memory_space<vmem>>, vector<1x128xf32>
    %4 = vector.broadcast %3 : vector<1x128xf32> to vector<16x128xf32>
    %5 = arith.addf %2, %4 : vector<16x128xf32>
    %c0_5 = arith.constant 0 : index
    %c0_6 = arith.constant 0 : index
    %6 = vector.load %arg4[%c0_5, %c0_6] : memref<16x128xf32, #tpu.memory_space<vmem>>, vector<16x128xf32>
    tpu.vector_store %arg4[%c0_5, %c0_6], %5 {strides = array<i32>} : memref<16x128xf32, #tpu.memory_space<vmem>>, vector<16x128xf32>,
    return
  }
  func.func @transform_0(%arg0: i32) -> (i32, i32) {
    %c0_i32 = arith.constant 0 : i32
    %c0_i32_0 = arith.constant 0 : i32
    return %arg0, %c0_i32 : i32, i32
  }
  func.func @transform_1(%arg0: i32) -> (i32, i32) {
    %c0_i32 = arith.constant 0 : i32
    %c0_i32_0 = arith.constant 0 : i32
    %c0_i32_1 = arith.constant 0 : i32
    return %c0_i32, %c0_i32_0 : i32, i32
  }
  func.func @transform_2(%arg0: i32) -> (i32, i32) {
    %c0_i32 = arith.constant 0 : i32
    %c0_i32_0 = arith.constant 0 : i32
    %c0_i32_1 = arith.constant 0 : i32
    return %c0_i32, %c0_i32_0 : i32, i32
  }
  func.func @transform_3(%arg0: i32) -> (i32, i32) {
    %c0_i32 = arith.constant 0 : i32
    %c0_i32_0 = arith.constant 0 : i32
    return %arg0, %c0_i32 : i32, i32
  }
}

</mosaic_0001>

<bundles_post_ra>
// kernel: aiimage_forward.1
= control target key start
LH: loop header
LB: loop body
LE: loop exit
PB: predicated region body
PF: predicated region fallthrough
CT: control target
= control target key end

     0   :  { %8 = vsyncpa [#allocation3], 0  ;;  %s890_s15 = smov [#allocation2]   ;;  %s891_s17 = smov 64   ;;  %s967_s0 = inlined_call_operand.vmem [shape: bf16[16,784], index: 0, kind: input, shape index: {}]   ;;  %s968_s1 = inlined_call_operand.hbm [shape: bf16[784,128], index: 1, kind: input, shape index: {}]   ;;  %s969_s2 = inlined_call_operand.vmem [shape: f32[1,128], index: 2, kind: input, shape index: {}]   ;;  %s970_s3 = inlined_call_operand.vmem [shape: f32[16,128], index: 3, kind: output, shape index: {}]  }
   0x1   :  { %s15_s14 = sshll.u32 %s968_s1, 4  ;;  %s17_s16 = sshll.u32 %s890_s15, 4  ;;  %s16_s14 = int_to_ptr.hbm [resolvable:$true] %s15_s14  ;;  %s18_s16 = int_to_ptr.vmem [resolvable:$true] %s17_s16 }
   0x2   :  { %s892_s18 = smov 4  }
   0x3   :  { %23 = dma.hbm_to_vmem [thread:$0]  %s16_s14, 6272, %s18_s16, [#allocation3], %s891_s17, %s891_s17, %s892_s18  }
   0x4   :  { %888 = dma.done.wait [#allocation3], 6272  }
   0x5   :  { %889 = vsyncadd [#allocation3], 4294961024  ;;  %v818_v0 = vld [vmem:[#allocation2 + $0x38] sm:$0xff]  ;;  %v817_v4 = vld [vmem:[#allocation2 + $0x30] sm:$0xff]  ;;  %vm470_vm0 = vcmask 130048  }
   0x6   :  { %v826_v1 = vld [vmem:[#allocation2 + $0x78] sm:$0xff]  ;;  %474 = vmatpush.bf16.msra.mxu0 %v818_v0  ;;  %v825_v5 = vld [vmem:[#allocation2 + $0x70] sm:$0xff]  ;;  %v816_v8 = vld [vmem:[#allocation2 + $0x28] sm:$0xff] }
   0x7   :  { %v834_v2 = vld [vmem:[#allocation2 + $0xb8] sm:$0xff]  ;;  %488 = vmatpush.bf16.msra.mxu1 %v826_v1  ;;  %v833_v6 = vld [vmem:[#allocation2 + $0xb0] sm:$0xff]  ;;  %v824_v9 = vld [vmem:[#allocation2 + $0x68] sm:$0xff] }
   0x8   :  { %v842_v3 = vld [vmem:[#allocation2 + $0xf8] sm:$0xff]  ;;  %502 = vmatpush.bf16.msra.mxu2 %v834_v2  ;;  %v841_v7 = vld [vmem:[#allocation2 + $0xf0] sm:$0xff]  ;;  %v832_v10 = vld [vmem:[#allocation2 + $0xa8] sm:$0xff] }
   0x9   :  { %516 = vmatpush.bf16.msra.mxu3 %v842_v3  ;;  %v840_v11 = vld [vmem:[#allocation2 + $0xe8] sm:$0xff]  ;;  %v815_v12 = vld [vmem:[#allocation2 + $0x20] sm:$0xff]  ;;  %v814_v16 = vld [vmem:[#allocation2 + $0x18] sm:$0xff] }
   0xa   :  { %475 = vmatpush.bf16.msra.mxu0 %v817_v4  ;;  %v823_v13 = vld [vmem:[#allocation2 + $0x60] sm:$0xff]  ;;  %v822_v17 = vld [vmem:[#allocation2 + $0x58] sm:$0xff]  ;;  %v813_v20 = vld [vmem:[#allocation2 + $0x10] sm:$0xff] }
   0xb   :  { %489 = vmatpush.bf16.msra.mxu1 %v825_v5  ;;  %v831_v14 = vld [vmem:[#allocation2 + $0xa0] sm:$0xff]  ;;  %v830_v18 = vld [vmem:[#allocation2 + $0x98] sm:$0xff]  ;;  %v821_v21 = vld [vmem:[#allocation2 + $0x50] sm:$0xff] }
   0xc   :  { %503 = vmatpush.bf16.msra.mxu2 %v833_v6  ;;  %v839_v15 = vld [vmem:[#allocation2 + $0xe0] sm:$0xff]  ;;  %v838_v19 = vld [vmem:[#allocation2 + $0xd8] sm:$0xff]  ;;  %v829_v22 = vld [vmem:[#allocation2 + $0x90] sm:$0xff] }
   0xd   :  { %517 = vmatpush.bf16.msra.mxu3 %v841_v7  ;;  %v837_v23 = vld [vmem:[#allocation2 + $0xd0] sm:$0xff]  ;;  %v812_v24 = vld [vmem:[#allocation2 + $0x8] sm:$0xff]  ;;  %v811_v28 = vld [vmem:[#allocation2] sm:$0xff] }
   0xe   :  { %476 = vmatpush.bf16.msra.mxu0 %v816_v8  ;;  %v820_v25 = vld [vmem:[#allocation2 + $0x48] sm:$0xff]  ;;  %v819_v29 = vld [vmem:[#allocation2 + $0x40] sm:$0xff]  ;;  %v807_v31 = vld [vmem:[%s967_s0 + $0x18] sm:$0xf0] }
   0xf   :  { %490 = vmatpush.bf16.msra.mxu1 %v824_v9  ;;  %v828_v26 = vld [vmem:[#allocation2 + $0x88] sm:$0xff]  ;;  %v581_v30 = vld [vmem:[%s967_s0] sm:$0xf]  ;;  %v804_v32 = vld [vmem:[%s967_s0 + $0x4] sm:$0xf] }
  0x10   :  { %504 = vmatpush.bf16.msra.mxu2 %v832_v10  ;;  %v836_v27 = vld [vmem:[#allocation2 + $0xc8] sm:$0xff]  ;;  %v583_v33 = vld [vmem:[%s967_s0 + $0x1c] sm:$0xf0]  ;;  %v850_v34 = vld [vmem:[#allocation2 + $0x138] sm:$0xff]  ;;  %v582_v40 = vor.u32 %v807_v31, %v581_v30 }
  0x11   :  { %518 = vmatpush.bf16.msra.mxu3 %v840_v11  ;;  %v858_v35 = vld [vmem:[#allocation2 + $0x178] sm:$0xff]  ;;  %v827_v36 = vld [vmem:[#allocation2 + $0x80] sm:$0xff]  ;;  %v589_v38 = vld [vmem:[%s967_s0 + $0x8] sm:$0xf]  ;;  %v586_v43 = vor.u32 %v804_v32, %v583_v33 }
  0x12   :  { %477 = vmatpush.bf16.msra.mxu0 %v815_v12  ;;  %v835_v37 = vld [vmem:[#allocation2 + $0xc0] sm:$0xff]  ;;  %v805_v41 = vld [vmem:[%s967_s0 + $0xc] sm:$0xf]  ;;  %v591_v42 = vld [vmem:[%s967_s0 + $0x24] sm:$0xf0] }
  0x13   :  { %491 = vmatpush.bf16.msra.mxu1 %v823_v13  ;;  %v808_v39 = vld [vmem:[%s967_s0 + $0x20] sm:$0xf0]  ;;  %v849_v45 = vld [vmem:[#allocation2 + $0x130] sm:$0xff]  ;;  %v594_v48 = vor.u32 %v805_v41, %v591_v42  ;;  %v848_v49 = vld [vmem:[#allocation2 + $0x128] sm:$0xff] }
  0x14   :  { %505 = vmatpush.bf16.msra.mxu2 %v831_v14  ;;  %v859_v44 = vld [vmem:[#allocation2 + $0x180] sm:$0xff]  ;;  %v857_v46 = vld [vmem:[#allocation2 + $0x170] sm:$0xff]  ;;  %v590_v47 = vor.u32 %v808_v39, %v589_v38  ;;  %v856_v50 = vld [vmem:[#allocation2 + $0x168] sm:$0xff] }
  0x15   :  { %519 = vmatpush.bf16.msra.mxu3 %v839_v15  ;;  %v847_v51 = vld [vmem:[#allocation2 + $0x120] sm:$0xff]  ;;  %v846_v53 = vld [vmem:[#allocation2 + $0x118] sm:$0xff]  ;;  %v810_v56 = vld [vmem:[%s967_s0 + $0x30] sm:$0xf0] }
  0x16   :  { %478 = vmatpush.bf16.msra.mxu0 %v814_v16  ;;  %v855_v52 = vld [vmem:[#allocation2 + $0x160] sm:$0xff]  ;;  %v854_v54 = vld [vmem:[#allocation2 + $0x158] sm:$0xff]  ;;  %v845_v57 = vld [vmem:[#allocation2 + $0x110] sm:$0xff] }
  0x17   :  { %492 = vmatpush.bf16.msra.mxu1 %v822_v17  ;;  %v605_v55 = vld [vmem:[%s967_s0 + $0x18] sm:$0xf]  ;;  %v853_v58 = vld [vmem:[#allocation2 + $0x150] sm:$0xff]  ;;  %v844_v60 = vld [vmem:[#allocation2 + $0x108] sm:$0xff] }
  0x18   :  { %506 = vmatpush.bf16.msra.mxu2 %v830_v18  ;;  %v606_v59 = vor.u32 %v810_v56, %v605_v55  ;;  %v852_v61 = vld [vmem:[#allocation2 + $0x148] sm:$0xff]  ;;  %v843_v62 = vld [vmem:[#allocation2 + $0x100] sm:$0xff]  ;;  %v597_v0 = vld [vmem:[%s967_s0 + $0x10] sm:$0xf] }
  0x19   :  { %520 = vmatpush.bf16.msra.mxu3 %v838_v19  ;;  %v851_v63 = vld [vmem:[#allocation2 + $0x140] sm:$0xff]  ;;  %v809_v1 = vld [vmem:[%s967_s0 + $0x28] sm:$0xf0]  ;;  %v806_v2 = vld [vmem:[%s967_s0 + $0x14] sm:$0xf] }
  0x1a   :  { %479 = vmatpush.bf16.msra.mxu0 %v813_v20  ;;  %v599_v3 = vld [vmem:[%s967_s0 + $0x2c] sm:$0xf0]  ;;  %v598_v4 = vor.u32 %v809_v1, %v597_v0  ;;  %v863_v9 = vld [vmem:[%s969_s2] ss:$0 sm:$0xff] }
  0x1b   :  { %493 = vmatpush.bf16.msra.mxu1 %v821_v21  ;;  %v602_v5 = vor.u32 %v806_v2, %v599_v3 }
  0x1c   :  { %507 = vmatpush.bf16.msra.mxu2 %v829_v22 }
  0x1d   :  { %521 = vmatpush.bf16.msra.mxu3 %v837_v23 }
  0x1e   :  { %480 = vmatpush.bf16.msra.mxu0 %v812_v24 }
  0x1f   :  { %494 = vmatpush.bf16.msra.mxu1 %v820_v25 }
  0x20   :  { %508 = vmatpush.bf16.msra.mxu2 %v828_v26 }
  0x21   :  { %522 = vmatpush.bf16.msra.mxu3 %v836_v27 }
  0x22   :  { %481 = vmatpush.bf16.msra.mxu0 %v811_v28 }
  0x23   :  { %495 = vmatpush.bf16.msra.mxu1 %v819_v29 }
  0x24   :  { %509 = vmatpush.bf16.msra.mxu2 %v827_v36 }
  0x25   :  { %523 = vmatpush.bf16.msra.mxu3 %v835_v37  ;;  %482 = vmatmul.bf16.vlgmr.msra.gmra.mxu0 %v582_v40 }
  0x26   :  { %530 = vmatpush.bf16.msrb.mxu0 %v850_v34  ;;  %496 = vmatmul.bf16.vlgmr.msra.gmra.mxu1 %v586_v43 }
  0x27   :  { %544 = vmatpush.bf16.msrb.mxu1 %v858_v35  ;;  %510 = vmatmul.bf16.vlgmr.msra.gmra.mxu2 %v590_v47 }
  0x28   :  { %565 = vmatpush.bf16.msrb.mxu2 %v859_v44  ;;  %524 = vmatmul.bf16.vlgmr.msra.gmra.mxu3 %v594_v48 }
  0x2a   :  { %531 = vmatpush.bf16.msrb.mxu0 %v849_v45 }
  0x2b   :  { %545 = vmatpush.bf16.msrb.mxu1 %v857_v46 }
  0x2e   :  { %532 = vmatpush.bf16.msrb.mxu0 %v848_v49 }
  0x2f   :  { %546 = vmatpush.bf16.msrb.mxu1 %v856_v50 }
  0x32   :  { %533 = vmatpush.bf16.msrb.mxu0 %v847_v51 }
  0x33   :  { %547 = vmatpush.bf16.msrb.mxu1 %v855_v52 }
  0x36   :  { %534 = vmatpush.bf16.msrb.mxu0 %v846_v53 }
  0x37   :  { %548 = vmatpush.bf16.msrb.mxu1 %v854_v54  ;;  %803 = vmatmul.msk.bf16.vlgmr.msrb.gmra.mxu2 %vm470_vm0, %v606_v59 }
  0x3a   :  { %535 = vmatpush.bf16.msrb.mxu0 %v845_v57 }
  0x3b   :  { %549 = vmatpush.bf16.msrb.mxu1 %v853_v58 }
  0x3e   :  { %536 = vmatpush.bf16.msrb.mxu0 %v844_v60 }
  0x3f   :  { %550 = vmatpush.bf16.msrb.mxu1 %v852_v61 }
  0x42   :  { %537 = vmatpush.bf16.msrb.mxu0 %v843_v62 }
  0x43   :  { %551 = vmatpush.bf16.msrb.mxu1 %v851_v63 }
  0x45   :  { %538 = vmatmul.bf16.vlgmr.msrb.gmra.mxu0 %v598_v4 }
  0x46   :  { %552 = vmatmul.bf16.vlgmr.msrb.gmra.mxu1 %v602_v5 }
  0xa2   :  { %v483_v6 = vpop.f32.mrf.mxu0 }
  0xa3   :  { %v497_v7 = vpop.f32.mrf.mxu1  ;;  %v484_v10 = vadd.f32 %v863_v9, %v483_v6 }
  0xa5   :  { %v498_v11 = vadd.f32 %v497_v7, %v484_v10 }
  0xaa   :  { %v511_v8 = vpop.f32.mrf.mxu2  ;;  %v485_v12 = vpop.f32.mrf.mxu0 }
  0xab   :  { %v499_v13 = vpop.f32.mrf.mxu1  ;;  %v525_v15 = vpop.f32.mrf.mxu3  ;;  %v512_v16 = vadd.f32 %v511_v8, %v498_v11  ;;  %v486_v17 = vadd.f32 %v863_v9, %v485_v12 }
  0xad   :  { %v526_v18 = vadd.f32 %v525_v15, %v512_v16  ;;  %v500_v19 = vadd.f32 %v499_v13, %v486_v17 }
  0xb2   :  { %v513_v14 = vpop.f32.mrf.mxu2 }
  0xb3   :  { %v514_v24 = vadd.f32 %v513_v14, %v500_v19  ;;  %v527_v26 = vpop.f32.mrf.mxu3 }
  0xb5   :  { %v528_v28 = vadd.f32 %v527_v26, %v514_v24 }
  0xba   :  { %v567_v23 = vpop.f32.mrf.mxu2 }
  0xc2   :  { %v539_v20 = vpop.f32.mrf.mxu0  ;;  %v569_v33 = vpop.f32.mrf.mxu2 }
  0xc3   :  { %v553_v21 = vpop.f32.mrf.mxu1  ;;  %v540_v22 = vadd.f32 %v539_v20, %v526_v18 }
  0xc5   :  { %v554_v25 = vadd.f32 %v553_v21, %v540_v22 }
  0xc7   :  { %v568_v27 = vadd.f32 %v567_v23, %v554_v25 }
  0xc9   :  { %572 = vst [vmem:[%s970_s3] sm:$0xff] %v568_v27 }
  0xca   :  { %v541_v29 = vpop.f32.mrf.mxu0 }
  0xcb   :  { %v542_v30 = vadd.f32 %v541_v29, %v528_v28  ;;  %v555_v31 = vpop.f32.mrf.mxu1 }
  0xcd   :  { %v556_v32 = vadd.f32 %v555_v31, %v542_v30 }
  0xcf   :  { %v570_v34 = vadd.f32 %v569_v33, %v556_v32 }
  0xd1   :  { %573 = vst [vmem:[%s970_s3 + $0x8] sm:$0xff] %v570_v34 }
  0xd2   :  { %578 = vsyncpa [#allocation3], 1 }

</bundles_post_ra>
